<compile_context>
chip_gen: v6e
topology: v6e:2x2x1
jax: 0.10.0
libtpu: 0.0.40
codegen_flags: <defaults>
</compile_context>

<pallas_src>
import functools

import jax
import jax.numpy as jnp
from jax.experimental import pallas as pl
from jax.experimental.pallas import tpu as pltpu


def _round_up(x, m):
    return (x + m - 1) // m * m


def _vmem_capacity_bytes():
    """Physical VMEM of the local TPU generation (64 MiB v7x, 128 MiB v5e/v6e).
    Falls back to the smallest (v7x-sized) value if the query fails."""
    try:
        cap = getattr(pltpu.get_tpu_info(), "vmem_capacity_bytes", None)
        if cap:
            return int(cap)
    except Exception:
        pass
    return 64 * 1024 * 1024


def _num_tensorcores():
    """TensorCores one pallas_call can spread a 'parallel' axis over.
    Conservative fallback of 1 (v5e/v6e behaviour) if the query fails."""
    try:
        info = pltpu.get_tpu_info()
        for attr in ("num_cores", "num_tensorcores", "tensorcore_count",
                     "cores_per_chip"):
            v = getattr(info, attr, None)
            if isinstance(v, int) and v > 0:
                return int(v)
    except Exception:
        pass
    try:
        v = getattr(jax.devices()[0], "num_cores", None)
        if isinstance(v, int) and v > 0:
            return int(v)
    except Exception:
        pass
    return 1


def _choose_block_n(n_rows, n_classes, in_itemsize, vmem_budget_bytes,
                    num_par, row_align):
    """Largest batch tile (multiple of row_align) whose VMEM working set fits.

    Working set per batch row (accumulator-free kernel):
      * double-buffered logits tile, lane-padded to 128      : 2 * Cpad * isz
      * double-buffered (row, 1) int32 target tile (padded)  : 2 * 128 * 4
      * per-row f32 accumulator + temporaries slack          : 2 * 128 * 4
    """
    c_pad = _round_up(n_classes, 128)
    per_row = 2 * c_pad * in_itemsize + 2 * 128 * 4 + 2 * 128 * 4
    bn = int(vmem_budget_bytes // max(per_row, 1))
    if num_par > 1:
        # Megacore balance: aim for >= ~4 blocks per TensorCore so both cores
        # stay busy and the input DMA pipeline reaches steady state.
        bn = min(bn, max(row_align, n_rows // (num_par * 4)))
    bn = min(bn, 4096, _round_up(n_rows, row_align))
    return max(row_align, (bn // row_align) * row_align)


def _ls_ce_kernel(x_ref, t_ref, out_ref, acc_ref, *, eps, num_classes,
                  n_valid_rows, block_n, blocks_per_par):
    j = pl.program_id(1)

    @pl.when(j == 0)
    def _():
        acc_ref[...] = jnp.zeros_like(acc_ref)

    # bf16 inputs stream from HBM at half the bytes; math stays f32
    # (required on v5e: no bf16 VPU/EUP there).
    x = x_ref[...].astype(jnp.float32)                        # (BN, C)

    # Per-row logsumexp.
    m = jnp.max(x, axis=-1, keepdims=True)                    # (BN, 1)
    z = m + jnp.log(jnp.sum(jnp.exp(x - m), axis=-1, keepdims=True))

    # sum_c x[n, c] and x[n, target[n]] (one-hot compare/select, no gather).
    sum_x = jnp.sum(x, axis=-1, keepdims=True)                # (BN, 1)
    tgt = t_ref[...]                                          # (BN, 1) int32
    col = jax.lax.broadcasted_iota(jnp.int32, x.shape, 1)
    x_t = jnp.sum(jnp.where(col == tgt, x, 0.0), axis=-1, keepdims=True)

    # Fused per-row loss (per-row difference formed BEFORE accumulation):
    #   loss_n = (eps/C)*(C*z - sum_x) + (1-eps)*(z - x_t)
    #          = z - (eps/C)*sum_x - (1-eps)*x_t
    loss_row = z - (eps / num_classes) * sum_x - (1.0 - eps) * x_t

    # Row-validity mask: with grid = cdiv(N, block_n) and no wrapper padding,
    # rows >= N in edge / duplicated blocks hold garbage.  jnp.where selects
    # 0.0 for those rows, so garbage (even NaN/Inf) never propagates.
    blk = pl.program_id(0) * blocks_per_par + j
    row = blk * block_n + jax.lax.broadcasted_iota(jnp.int32, (block_n, 1), 0)
    loss_row = jnp.where(row < n_valid_rows, loss_row, 0.0)

    # Single (block_n, 1) per-row accumulator: cheap full-width VALU add; no
    # (block_n, C) accumulator read-modify-write through the store slot.
    acc_ref[...] += loss_row

    @pl.when(j == pl.num_programs(1) - 1)
    def _():
        out_ref[...] = jnp.zeros_like(out_ref) + jnp.sum(acc_ref[...])


def label_smoothing_cross_entropy(logits, target, eps=0.1, reduction="mean",
                                  block_n=None, num_par=None):
    """Forward of fastai's LabelSmoothingCrossEntropy.

    logits: (N, C) float32/bfloat16; target: (N,) integer class ids.
    reduction: 'mean' or 'sum'.  block_n / num_par: optional overrides
    (auto-sized for the local TPU generation when None).
    """
    N, C = logits.shape
    t2d = target.astype(jnp.int32).reshape(N, 1)
    itemsize = jnp.dtype(logits.dtype).itemsize
    # bf16 packs 2 rows per sublane ((16,128) tile): align the batch tile.
    row_align = 16 if itemsize < 4 else 8

    cap = _vmem_capacity_bytes()
    num_cores = _num_tensorcores() if num_par is None else max(1, int(num_par))

    if block_n is None:
        block_n = _choose_block_n(N, C, itemsize, int(cap * 0.6),
                                  num_cores, row_align)
    block_n = int(block_n)
    assert block_n % row_align == 0, (
        f"block_n must be a multiple of {row_align} for dtype {logits.dtype}")

    total_blocks = int(pl.cdiv(N, block_n))
    num_par = max(1, min(num_cores, total_blocks))
    blocks_per_par = int(pl.cdiv(total_blocks, num_par))
    last_block = total_blocks - 1

    # No wrapper-side jnp.pad (full HBM->HBM copy of the logits): clamp the
    # block index so edge / duplicated blocks stay in bounds; the kernel masks
    # invalid rows.
    def _block_map(i, j):
        return (jnp.minimum(i * blocks_per_par + j, last_block), 0)

    # VMEM limit derived from actual buffer sizes (+ headroom for compiler
    # internal scratch) instead of a fixed fraction of physical VMEM.
    c_pad = _round_up(C, 128)
    per_row = 2 * c_pad * itemsize + 4 * 128 * 4
    vmem_needed = block_n * per_row + 2 * 8 * 128 * 4 + (4 << 20)
    vmem_limit = int(min(max(vmem_needed, 16 << 20),
                         int(cap * 0.9), 100 * 1024 * 1024))

    kernel = functools.partial(
        _ls_ce_kernel, eps=float(eps), num_classes=C, n_valid_rows=N,
        block_n=block_n, blocks_per_par=blocks_per_par)

    res = pl.pallas_call(
        kernel,
        out_shape=jax.ShapeDtypeStruct((num_par, 8, 128), jnp.float32),
        grid_spec=pltpu.PrefetchScalarGridSpec(
            num_scalar_prefetch=0,
            grid=(num_par, blocks_per_par),
            in_specs=[
                pl.BlockSpec((block_n, C), _block_map),
                pl.BlockSpec((block_n, 1), _block_map),
            ],
            out_specs=pl.BlockSpec((1, 8, 128), lambda i, j: (i, 0, 0)),
            scratch_shapes=[
                pltpu.VMEM((block_n, 1), jnp.float32),   # per-row loss acc
            ],
        ),
        compiler_params=pltpu.CompilerParams(
            dimension_semantics=("parallel", "arbitrary"),
            vmem_limit_bytes=vmem_limit,
        ),
    )(logits, t2d)

    loss_sum = jnp.sum(res[:, 0, 0])
    if reduction == "sum":
        return loss_sum
    if reduction == "mean":
        return loss_sum / N
    # TODO(synk): reduction='none' needs per-row kernel outputs.
    raise NotImplementedError("reduction must be 'mean' or 'sum'")


def _reference(logits, target, eps=0.1):
    # Pure-JAX reference of the PyTorch forward (reduction='mean').
    c = logits.shape[-1]
    logp = jax.nn.log_softmax(logits.astype(jnp.float32), axis=-1)
    loss = jnp.mean(-jnp.sum(logp, axis=-1))
    nll = jnp.mean(-jnp.take_along_axis(logp, target[:, None], axis=-1)[:, 0])
    return loss * eps / c + (1.0 - eps) * nll


if __name__ == "__main__":
    key = jax.random.PRNGKey(0)
    k1, k2, k3, k4, k5, k6 = jax.random.split(key, 6)
    C = 32

    # Case 1: production path — auto-sized tile, single block, f32 logits.
    N1 = 48
    logits1 = jax.random.normal(k1, (N1, C), dtype=jnp.float32)
    target1 = jax.random.randint(k2, (N1,), 0, C, dtype=jnp.int32)
    out1 = jax.block_until_ready(
        label_smoothing_cross_entropy(logits1, target1, eps=0.1))
    ref1 = _reference(logits1, target1, eps=0.1)
    assert jnp.allclose(out1, ref1, atol=1e-5, rtol=1e-5), (out1, ref1)

    # Case 2: force a small tile and a 2-way "parallel" axis so the demo also
    # exercises the multi-block accumulation sweep, the partial-tail row
    # masking (N=40 is not a multiple of 16) and the clamped duplicate block
    # on the second parallel slice (3 blocks split 2+2).
    N2 = 40
    logits2 = jax.random.normal(k3, (N2, C), dtype=jnp.float32)
    target2 = jax.random.randint(k4, (N2,), 0, C, dtype=jnp.int32)
    out2 = jax.block_until_ready(
        label_smoothing_cross_entropy(logits2, target2, eps=0.1,
                                      block_n=16, num_par=2))
    ref2 = _reference(logits2, target2, eps=0.1)
    assert jnp.allclose(out2, ref2, atol=1e-5, rtol=1e-5), (out2, ref2)

    # Case 3: bf16 logits (halved HBM read traffic, 16-row tile alignment);
    # kernel upcasts to f32 internally, so it matches the f32 reference on
    # the same bf16-quantized values.
    N3 = 24
    logits3 = jax.random.normal(k5, (N3, C), dtype=jnp.float32).astype(jnp.bfloat16)
    target3 = jax.random.randint(k6, (N3,), 0, C, dtype=jnp.int32)
    out3 = jax.block_until_ready(
        label_smoothing_cross_entropy(logits3, target3, eps=0.1))
    ref3 = _reference(logits3, target3, eps=0.1)
    assert jnp.allclose(out3, ref3, atol=1e-4, rtol=1e-4), (out3, ref3)

    print("KERNEL_OK")
</pallas_src>

<mosaic_0001>
module attributes {stable_mosaic.version = 11 : i64} {
  func.func @_ls_ce_kernel(%arg0: i32, %arg1: i32, %arg2: memref<48x32xf32, #tpu.memory_space<vmem>>, %arg3: memref<48x1xi32, #tpu.memory_space<vmem>>, %arg4: memref<1x8x128xf32, #tpu.memory_space<vmem>>, %arg5: memref<48x1xf32, #tpu.memory_space<vmem>>) attributes {dimension_semantics = [#tpu.dimension_semantics<parallel>, #tpu.dimension_semantics<arbitrary>], iteration_bounds = array<i64: 1, 1>, scalar_prefetch = 0 : i64, scratch_operands = 1 : i64, tpu.core_type = #tpu.core_type<tc>, window_params = [{transform_indices = @transform_0, window_bounds = array<i64: 48, 32>}, {transform_indices = @transform_1, window_bounds = array<i64: 48, 1>}, {transform_indices = @transform_2, window_bounds = array<i64: 1, 8, 128>}]} {
    %c0_i32 = arith.constant 0 : i32
    %0 = arith.cmpi eq, %arg1, %c0_i32 : i32
    %1 = arith.extui %0 : i1 to i32
    %c0_i32_0 = arith.constant 0 : i32
    %2 = arith.cmpi ne, %1, %c0_i32_0 : i32
    scf.if %2 {
      %cst_18 = arith.constant 0.000000e+00 : f32
      %45 = vector.broadcast %cst_18 : f32 to vector<48x1xf32>
      %c0_19 = arith.constant 0 : index
      %c0_20 = arith.constant 0 : index
      %46 = vector.load %arg5[%c0_19, %c0_20] : memref<48x1xf32, #tpu.memory_space<vmem>>, vector<48x1xf32>
      tpu.vector_store %arg5[%c0_19, %c0_20], %45 {strides = array<i32>} : memref<48x1xf32, #tpu.memory_space<vmem>>, vector<48x1xf32>,
    } else {
    }
    %c0 = arith.constant 0 : index
    %c0_1 = arith.constant 0 : index
    %3 = vector.load %arg2[%c0, %c0_1] : memref<48x32xf32, #tpu.memory_space<vmem>>, vector<48x32xf32>
    %cst = arith.constant dense<0xFF800000> : vector<48xf32>
    %4 = vector.multi_reduction <maximumf>, %3, %cst [1] : vector<48x32xf32> to vector<48xf32>
    %5 = vector.shape_cast %4 : vector<48xf32> to vector<48x1xf32>
    %6 = vector.broadcast %5 : vector<48x1xf32> to vector<48x32xf32>
    %7 = arith.subf %3, %6 : vector<48x32xf32>
    %8 = math.exp %7 : vector<48x32xf32>
    %cst_2 = arith.constant dense<0.000000e+00> : vector<48xf32>
    %9 = vector.multi_reduction <add>, %8, %cst_2 [1] : vector<48x32xf32> to vector<48xf32>
    %10 = vector.shape_cast %9 : vector<48xf32> to vector<48x1xf32>
    %11 = math.log %10 : vector<48x1xf32>
    %12 = arith.addf %5, %11 : vector<48x1xf32>
    %cst_3 = arith.constant dense<0.000000e+00> : vector<48xf32>
    %13 = vector.multi_reduction <add>, %3, %cst_3 [1] : vector<48x32xf32> to vector<48xf32>
    %14 = vector.shape_cast %13 : vector<48xf32> to vector<48x1xf32>
    %c0_4 = arith.constant 0 : index
    %c0_5 = arith.constant 0 : index
    %15 = vector.load %arg3[%c0_4, %c0_5] : memref<48x1xi32, #tpu.memory_space<vmem>>, vector<48x1xi32>
    %16 = tpu.iota {dimensions = array<i32: 1>} : vector<48x32xi32>
    %17 = vector.broadcast %15 : vector<48x1xi32> to vector<48x32xi32>
    %18 = arith.cmpi eq, %16, %17 : vector<48x32xi32>
    %cst_6 = arith.constant 0.000000e+00 : f32
    %19 = vector.broadcast %cst_6 : f32 to vector<48x32xf32>
    %20 = arith.select %18, %3, %19 : vector<48x32xi1>, vector<48x32xf32>
    %cst_7 = arith.constant dense<0.000000e+00> : vector<48xf32>
    %21 = vector.multi_reduction <add>, %20, %cst_7 [1] : vector<48x32xf32> to vector<48xf32>
    %22 = vector.shape_cast %21 : vector<48xf32> to vector<48x1xf32>
    %cst_8 = arith.constant 3.125000e-03 : f32
    %23 = vector.broadcast %cst_8 : f32 to vector<48x1xf32>
    %24 = arith.mulf %23, %14 : vector<48x1xf32>
    %25 = arith.subf %12, %24 : vector<48x1xf32>
    %cst_9 = arith.constant 0.899999976 : f32
    %26 = vector.broadcast %cst_9 : f32 to vector<48x1xf32>
    %27 = arith.mulf %26, %22 : vector<48x1xf32>
    %28 = arith.subf %25, %27 : vector<48x1xf32>
    %c1_i32 = arith.constant 1 : i32
    %29 = arith.muli %arg0, %c1_i32 : i32
    %30 = arith.addi %29, %arg1 : i32
    %c48_i32 = arith.constant 48 : i32
    %31 = arith.muli %30, %c48_i32 : i32
    %32 = tpu.iota {dimensions = array<i32: 0>} : vector<48x1xi32>
    %33 = vector.broadcast %31 : i32 to vector<48x1xi32>
    %34 = arith.addi %33, %32 : vector<48x1xi32>
    %c48_i32_10 = arith.constant 48 : i32
    %35 = vector.broadcast %c48_i32_10 : i32 to vector<48x1xi32>
    %36 = arith.cmpi slt, %34, %35 : vector<48x1xi32>
    %cst_11 = arith.constant 0.000000e+00 : f32
    %37 = vector.broadcast %cst_11 : f32 to vector<48x1xf32>
    %38 = arith.select %36, %28, %37 : vector<48x1xi1>, vector<48x1xf32>
    %c0_12 = arith.constant 0 : index
    %c0_13 = arith.constant 0 : index
    %39 = vector.load %arg5[%c0_12, %c0_13] : memref<48x1xf32, #tpu.memory_space<vmem>>, vector<48x1xf32>
    %40 = arith.addf %39, %38 : vector<48x1xf32>
    %c0_14 = arith.constant 0 : index
    %c0_15 = arith.constant 0 : index
    %41 = vector.load %arg5[%c0_14, %c0_15] : memref<48x1xf32, #tpu.memory_space<vmem>>, vector<48x1xf32>
    tpu.vector_store %arg5[%c0_14, %c0_15], %40 {strides = array<i32>} : memref<48x1xf32, #tpu.memory_space<vmem>>, vector<48x1xf32>,
    %c0_i32_16 = arith.constant 0 : i32
    %42 = arith.cmpi eq, %arg1, %c0_i32_16 : i32
    %43 = arith.extui %42 : i1 to i32
    %c0_i32_17 = arith.constant 0 : i32
    %44 = arith.cmpi ne, %43, %c0_i32_17 : i32
    scf.if %44 {
      %cst_18 = arith.constant 0.000000e+00 : f32
      %45 = vector.broadcast %cst_18 : f32 to vector<1x8x128xf32>
      %c0_19 = arith.constant 0 : index
      %c0_20 = arith.constant 0 : index
      %46 = vector.load %arg5[%c0_19, %c0_20] : memref<48x1xf32, #tpu.memory_space<vmem>>, vector<48x1xf32>
      %47 = vector.shape_cast %46 : vector<48x1xf32> to vector<1x48x1xf32>
      %cst_21 = arith.constant dense<0.000000e+00> : vector<1xf32>
      %48 = vector.multi_reduction <add>, %47, %cst_21 [1, 2] : vector<1x48x1xf32> to vector<1xf32>
      %49 = vector.shape_cast %48 : vector<1xf32> to vector<1x1x1xf32>
      %50 = vector.extract %49[0, 0, 0] : f32 from vector<1x1x1xf32>
      %51 = vector.broadcast %50 : f32 to vector<1x8x128xf32>
      %52 = arith.addf %45, %51 : vector<1x8x128xf32>
      %c0_22 = arith.constant 0 : index
      %c0_23 = arith.constant 0 : index
      %c0_24 = arith.constant 0 : index
      %53 = vector.load %arg4[%c0_22, %c0_23, %c0_24] : memref<1x8x128xf32, #tpu.memory_space<vmem>>, vector<1x8x128xf32>
      tpu.vector_store %arg4[%c0_22, %c0_23, %c0_24], %52 {strides = array<i32>} : memref<1x8x128xf32, #tpu.memory_space<vmem>>, vector<1x8x128xf32>,
    } else {
    }
    return
  }
  func.func @transform_0(%arg0: i32, %arg1: i32) -> (i32, i32) {
    %c1_i32 = arith.constant 1 : i32
    %0 = arith.muli %arg0, %c1_i32 : i32
    %1 = arith.addi %0, %arg1 : i32
    %c0_i32 = arith.constant 0 : i32
    %2 = arith.minsi %1, %c0_i32 : i32
    %c0_i32_0 = arith.constant 0 : i32
    %c0_i32_1 = arith.constant 0 : i32
    return %2, %c0_i32_0 : i32, i32
  }
  func.func @transform_1(%arg0: i32, %arg1: i32) -> (i32, i32) {
    %c1_i32 = arith.constant 1 : i32
    %0 = arith.muli %arg0, %c1_i32 : i32
    %1 = arith.addi %0, %arg1 : i32
    %c0_i32 = arith.constant 0 : i32
    %2 = arith.minsi %1, %c0_i32 : i32
    %c0_i32_0 = arith.constant 0 : i32
    %c0_i32_1 = arith.constant 0 : i32
    return %2, %c0_i32_0 : i32, i32
  }
  func.func @transform_2(%arg0: i32, %arg1: i32) -> (i32, i32, i32) {
    %c0_i32 = arith.constant 0 : i32
    %c0_i32_0 = arith.constant 0 : i32
    %c0_i32_1 = arith.constant 0 : i32
    return %arg0, %c0_i32, %c0_i32_0 : i32, i32, i32
  }
}

</mosaic_0001>

<bundles_post_ra>
// kernel: tpu_custom_call.1
= control target key start
LH: loop header
LB: loop body
LE: loop exit
PB: predicated region body
PF: predicated region fallthrough
CT: control target
= control target key end

     0   :  { %vm93_vm0 = vcmask 261120   ;;  %v422_v6 = vmov 0   ;;  %s581_s0 = inlined_call_operand.vmem [shape: f32[48,32], index: 0, kind: input, shape index: {}]   ;;  %s582_s1 = inlined_call_operand.vmem [shape: s32[48,1], index: 1, kind: input, shape index: {}]   ;;  %s583_s2 = inlined_call_operand.hbm [shape: f32[1,8,128], index: 2, kind: output, shape index: {}]  }
   0x1   :  { %v443_v0 = vld [vmem:[%s581_s0] sm:$0xff]  ;;  %v448_v1 = vld [vmem:[%s581_s0 + $0x10] sm:$0xff]  ;;  %v453_v2 = vld [vmem:[%s581_s0 + $0x8] sm:$0xff]  ;;  %375 = vset.pattern.permute.xlu1 %v422_v6  ;;  %374 = vset.pattern.permute.xlu0 %v422_v6 }
   0x2   :  { %v94_v3 = vsel %vm93_vm0, %v443_v0, -inf  ;;  %v100_v4 = vsel %vm93_vm0, %v448_v1, -inf  ;;  %v462_v5 = vld [vmem:[%s581_s0 + $0x18] sm:$0xff]  ;;  %v97_v7 = vsel %vm93_vm0, %v453_v2, -inf  ;;  %v471_v9 = vld [vmem:[%s581_s0 + $0x20] sm:$0xff]  ;;  %v476_v10 = vld [vmem:[%s581_s0 + $0x28] sm:$0xff] }
   0x3   :  { %95 = vmax.xlane.f32.xlu0 %v94_v3  ;;  %101 = vmax.xlane.f32.xlu1 %v100_v4  ;;  %v103_v8 = vsel %vm93_vm0, %v462_v5, -inf }
   0x4   :  { %7 = vsyncpa [#allocation4], 0  ;;  %v106_v11 = vsel %vm93_vm0, %v471_v9, -inf  ;;  %v109_v12 = vsel %vm93_vm0, %v476_v10, -inf  ;;  %v185_v13 = vld [vmem:[%s582_s1 + $0x8] sm:$0xff]  ;;  %v186_v14 = vld [vmem:[%s582_s1 + $0x10] sm:$0xff]  ;;  %v190_v42 = vlaneseq }
   0x5   :  { %v184_v15 = vld [vmem:[%s582_s1] sm:$0xff]  ;;  %v187_v16 = vld [vmem:[%s582_s1 + $0x18] sm:$0xff]  ;;  %v189_v18 = vld [vmem:[%s582_s1 + $0x28] sm:$0xff]  ;;  %v166_v19 = vsel %vm93_vm0, %v443_v0, 0.0  ;;  %v169_v20 = vsel %vm93_vm0, %v453_v2, 0.0  ;;  %v172_v56 = vsel %vm93_vm0, %v448_v1, 0.0 }
   0x6   :  { %v188_v17 = vld [vmem:[%s582_s1 + $0x20] sm:$0xff]  ;;  %v191_v47 = vand.u32 127, %v190_v42  ;;  %v175_v3 = vsel %vm93_vm0, %v462_v5, 0.0  ;;  %v178_v4 = vsel %vm93_vm0, %v471_v9, 0.0  ;;  %vm80_vm6 = vcmask 7168   ;;  %s424_s1 = smov [#allocation3]  }
   0x7   :  { %98 = vmax.xlane.f32.xlu0 %v97_v7  ;;  %104 = vmax.xlane.f32.xlu1 %v103_v8  ;;  %v181_v8 = vsel %vm93_vm0, %v476_v10, 0.0  ;;  %s349_s4 = sshll.u32 %s424_s1, 4  ;;  %s350_s4 = int_to_ptr.vmem [resolvable:$true] %s349_s4 }
   0x8   :  { %s400_s6 = scalar_lea.vmem %s350_s4, 128  ;;  %p405_p1 = scmp.lt.s32.totalorder %s350_s4, %s350_s4 }
   0x9   :  { %p401_p0 = scmp.ne.s32.totalorder %s350_s4, %s400_s6  ;;  %p406_p2 = scmp.lt.s32.totalorder %s400_s6, %s400_s6 }
   0xb   :  { %107 = vmax.xlane.f32.xlu0 %v106_v11  ;;  %110 = vmax.xlane.f32.xlu1 %v109_v12  ;;  %v423_v11 = vmov 0.0   ;;  %p407_p3 = por %p406_p2, %p405_p1 }
   0xc   :  { %81 = vst.msk [vmem:[#allocation2] sm:$0xff] %vm80_vm6, %v423_v11  ;;  %82 = vst.msk [vmem:[#allocation2 + $0x8] sm:$0xff] %vm80_vm6, %v423_v11 }
   0xd   :  { %83 = vst.msk [vmem:[#allocation2 + $0x10] sm:$0xff] %vm80_vm6, %v423_v11  ;;  %84 = vst.msk [vmem:[#allocation2 + $0x18] sm:$0xff] %vm80_vm6, %v423_v11  ;;  %p408_p4 = pnand %p407_p3, %p401_p0 }
   0xe   :  { %85 = vst.msk [vmem:[#allocation2 + $0x20] sm:$0xff] %vm80_vm6, %v423_v11  ;;  %86 = vst.msk [vmem:[#allocation2 + $0x28] sm:$0xff] %vm80_vm6, %v423_v11 }
  0x1c   :  { %196 = vperm.xlu1 %375, %v185_v13  }
  0x20   :  { %199 = vperm.xlu1 %375, %v186_v14  }
  0x21   :  { %193 = vperm.xlu0 %374, %v184_v15  }
  0x24   :  { %202 = vperm.xlu1 %375, %v187_v16  }
  0x28   :  { %205 = vperm.xlu1 %375, %v188_v17  }
  0x2c   :  { %208 = vperm.xlu1 %375, %v189_v18  }
  0x40   :  { %167 = vadd.xlane.f32.xlu0 %v166_v19 }
  0x50   :  { %170 = vadd.xlane.f32.xlu1 %v169_v20 }
  0x8c   :  { %v504_v21 = vpop.xlane.xlu0 %95  ;;  %v506_v22 = vpop.xlane.xlu1 %101 }
  0x8d   :  { %v112_v23 = vsub.f32 %v443_v0, %v504_v21  ;;  %v114_v24 = vsub.f32 %v448_v1, %v506_v22 }
  0x8f   :  { %v118_v25 = vmul.f32 1.442695, %v112_v23  ;;  %v122_v26 = vmul.f32 1.442695, %v114_v24 }
  0x90   :  { %v512_v27 = vpop.xlane.xlu0 %98  ;;  %v514_v28 = vpop.xlane.xlu1 %104 }
  0x91   :  { %376 = vpow2.f32 %v118_v25  ;;  %v113_v29 = vsub.f32 %v453_v2, %v512_v27  ;;  %v115_v30 = vsub.f32 %v462_v5, %v514_v28 }
  0x92   :  { %378 = vpow2.f32 %v122_v26 }
  0x93   :  { %v120_v31 = vmul.f32 1.442695, %v113_v29  ;;  %v124_v32 = vmul.f32 1.442695, %v115_v30 }
  0x94   :  { %v520_v33 = vpop.xlane.xlu0 %107  ;;  %v522_v34 = vpop.xlane.xlu1 %110 }
  0x95   :  { %380 = vpow2.f32 %v120_v31  ;;  %v116_v35 = vsub.f32 %v471_v9, %v520_v33  ;;  %v117_v36 = vsub.f32 %v476_v10, %v522_v34 }
  0x96   :  { %382 = vpow2.f32 %v124_v32 }
  0x97   :  { %v126_v37 = vmul.f32 1.442695, %v116_v35  ;;  %v128_v38 = vmul.f32 1.442695, %v117_v36 }
  0x98   :  { %v197_v40 = vpop.permute.xlu1 %196 }
  0x99   :  { %384 = vpow2.f32 %v126_v37  ;;  %vm211_vm1 = vcmp.eq.s32.totalorder %v191_v47, %v197_v40 }
  0x9a   :  { %386 = vpow2.f32 %v128_v38  ;;  %v217_v58 = vsel %vm211_vm1, %v453_v2, 0.0 }
  0x9b   :  { %v225_v60 = vsel %vm93_vm0, %v217_v58, 0.0 }
  0x9c   :  { %v200_v49 = vpop.permute.xlu1 %199  ;;  %v194_v50 = vpop.permute.xlu0 %193 }
  0x9d   :  { %vm210_vm2 = vcmp.eq.s32.totalorder %v191_v47, %v194_v50  ;;  %vm212_vm3 = vcmp.eq.s32.totalorder %v191_v47, %v200_v49 }
  0x9e   :  { %v377_v39 = vpop.eup %376  ;;  %v216_v59 = vsel %vm210_vm2, %v443_v0, 0.0  ;;  %v218_v63 = vsel %vm212_vm3, %v448_v1, 0.0 }
  0x9f   :  { %v379_v41 = vpop.eup %378  ;;  %v130_v43 = vsel %vm93_vm0, %v377_v39, 0.0  ;;  %v222_v61 = vsel %vm93_vm0, %v216_v59, 0.0  ;;  %v228_v2 = vsel %vm93_vm0, %v218_v63, 0.0  ;;  %v292_v39 = vld [vmem:[#allocation2] sm:$0xff] }
  0xa0   :  { %131 = vadd.xlane.f32.xlu1 %v130_v43  ;;  %v136_v44 = vsel %vm93_vm0, %v379_v41, 0.0  ;;  %v203_v57 = vpop.permute.xlu1 %202 }
  0xa1   :  { %vm213_vm4 = vcmp.eq.s32.totalorder %v191_v47, %v203_v57 }
  0xa2   :  { %v381_v45 = vpop.eup %380  ;;  %v219_v0 = vsel %vm213_vm4, %v462_v5, 0.0 }
  0xa3   :  { %v383_v46 = vpop.eup %382  ;;  %v133_v48 = vsel %vm93_vm0, %v381_v45, 0.0  ;;  %v231_v7 = vsel %vm93_vm0, %v219_v0, 0.0 }
  0xa4   :  { %137 = vadd.xlane.f32.xlu1 %v136_v44  ;;  %134 = vadd.xlane.f32.xlu0 %v133_v48  ;;  %v139_v51 = vsel %vm93_vm0, %v383_v46, 0.0  ;;  %v206_v62 = vpop.permute.xlu1 %205 }
  0xa5   :  { %vm214_vm5 = vcmp.eq.s32.totalorder %v191_v47, %v206_v62 }
  0xa6   :  { %v385_v52 = vpop.eup %384  ;;  %v220_v1 = vsel %vm214_vm5, %v471_v9, 0.0 }
  0xa7   :  { %v387_v53 = vpop.eup %386  ;;  %v142_v54 = vsel %vm93_vm0, %v385_v52, 0.0  ;;  %v234_v5 = vsel %vm93_vm0, %v220_v1, 0.0  ;;  %v295_v1 = vld [vmem:[#allocation2 + $0x18] sm:$0xff] }
  0xa8   :  { %140 = vadd.xlane.f32.xlu1 %v139_v51  ;;  %143 = vadd.xlane.f32.xlu0 %v142_v54  ;;  %v145_v55 = vsel %vm93_vm0, %v387_v53, 0.0  ;;  %v209_v6 = vpop.permute.xlu1 %208 }
  0xa9   :  { %vm215_vm7 = vcmp.eq.s32.totalorder %v191_v47, %v209_v6 }
  0xaa   :  { %v221_v9 = vsel %vm215_vm7, %v476_v10, 0.0 }
  0xab   :  { %v237_v12 = vsel %vm93_vm0, %v221_v9, 0.0 }
  0xac   :  { %146 = vadd.xlane.f32.xlu1 %v145_v55  ;;  %173 = vadd.xlane.f32.xlu0 %v172_v56  ;;  %v294_v55 = vld [vmem:[#allocation2 + $0x10] sm:$0xff] }
  0xb0   :  { %226 = vadd.xlane.f32.xlu0 %v225_v60  ;;  %223 = vadd.xlane.f32.xlu1 %v222_v61 }
  0xb4   :  { %229 = vadd.xlane.f32.xlu0 %v228_v2  ;;  %176 = vadd.xlane.f32.xlu1 %v175_v3 }
  0xb8   :  { %232 = vadd.xlane.f32.xlu0 %v231_v7  ;;  %179 = vadd.xlane.f32.xlu1 %v178_v4 }
  0xbc   :  { %235 = vadd.xlane.f32.xlu0 %v234_v5  ;;  %182 = vadd.xlane.f32.xlu1 %v181_v8 }
  0xc0   :  { %238 = vadd.xlane.f32.xlu1 %v237_v12 }
  0xc9   :  { %v168_v14 = vpop.xlane.xlu0 %167 }
  0xca   :  { %v240_v30 = vmul.f32 0.003125, %v168_v14 }
  0xd9   :  { %v171_v13 = vpop.xlane.xlu1 %170 }
  0xda   :  { %v241_v46 = vmul.f32 0.003125, %v171_v13  ;;  %v296_v13 = vld [vmem:[#allocation2 + $0x20] sm:$0xff] }
 0x129   :  { %v132_v15 = vpop.xlane.xlu1 %131 }
 0x12a   :  { %388 = vlog2.f32 %v132_v15 }
 0x12d   :  { %v138_v16 = vpop.xlane.xlu1 %137  ;;  %v135_v17 = vpop.xlane.xlu0 %134 }
 0x12e   :  { %390 = vlog2.f32 %v138_v16 }
 0x12f   :  { %392 = vlog2.f32 %v135_v17 }
 0x131   :  { %v141_v18 = vpop.xlane.xlu1 %140  ;;  %v144_v19 = vpop.xlane.xlu0 %143 }
 0x132   :  { %394 = vlog2.f32 %v141_v18 }
 0x133   :  { %396 = vlog2.f32 %v144_v19  ;;  %v297_v19 = vld [vmem:[#allocation2 + $0x28] sm:$0xff] }
 0x135   :  { %v147_v20 = vpop.xlane.xlu1 %146  ;;  %v174_v23 = vpop.xlane.xlu0 %173 }
 0x136   :  { %398 = vlog2.f32 %v147_v20  ;;  %v242_v43 = vmul.f32 0.003125, %v174_v23 }
 0x137   :  { %v389_v24 = vpop.eup %388 }
 0x138   :  { %v149_v10 = vmul.f32 0.6931472, %v389_v24 }
 0x139   :  { %v224_v25 = vpop.xlane.xlu1 %223  ;;  %v227_v26 = vpop.xlane.xlu0 %226 }
 0x13a   :  { %v160_v29 = vadd.f32 %v149_v10, %v504_v21  ;;  %v252_v37 = vmul.f32 0.9, %v224_v25  ;;  %v253_v54 = vmul.f32 0.9, %v227_v26 }
 0x13b   :  { %v391_v31 = vpop.eup %390 }
 0x13c   :  { %v393_v32 = vpop.eup %392  ;;  %v246_v35 = vsub.f32 %v160_v29, %v240_v30  ;;  %v153_v36 = vmul.f32 0.6931472, %v391_v31 }
 0x13d   :  { %v151_v38 = vmul.f32 0.6931472, %v393_v32  ;;  %v177_v40 = vpop.xlane.xlu1 %176  ;;  %v230_v41 = vpop.xlane.xlu0 %229 }
 0x13e   :  { %v162_v42 = vadd.f32 %v153_v36, %v506_v22  ;;  %v258_v44 = vsub.f32 %v246_v35, %v252_v37  ;;  %v254_v51 = vmul.f32 0.9, %v230_v41  ;;  %v293_v22 = vld [vmem:[#allocation2 + $0x8] sm:$0xff]  ;;  %v243_v59 = vmul.f32 0.003125, %v177_v40 }
 0x13f   :  { %v395_v45 = vpop.eup %394  ;;  %v161_v47 = vadd.f32 %v151_v38, %v512_v27 }
 0x140   :  { %v397_v48 = vpop.eup %396  ;;  %v155_v21 = vmul.f32 0.6931472, %v395_v45  ;;  %v248_v49 = vsub.f32 %v162_v42, %v242_v43  ;;  %v298_v50 = vadd.f32 %v292_v39, %v258_v44 }
 0x141   :  { %v157_v52 = vmul.f32 0.6931472, %v397_v48  ;;  %v247_v53 = vsub.f32 %v161_v47, %v241_v46  ;;  %v180_v56 = vpop.xlane.xlu1 %179  ;;  %v233_v57 = vpop.xlane.xlu0 %232 }
 0x142   :  { %305 = vst.msk [vmem:[#allocation2] sm:$0xff] %vm80_vm6, %v298_v50  ;;  %v163_v58 = vadd.f32 %v155_v21, %v514_v28  ;;  %v260_v60 = vsub.f32 %v248_v49, %v254_v51  ;;  %v244_v61 = vmul.f32 0.003125, %v180_v56  ;;  %v255_v4 = vmul.f32 0.9, %v233_v57 }
 0x143   :  { %v399_v27 = vpop.eup %398  ;;  %v259_v62 = vsub.f32 %v247_v53, %v253_v54  ;;  %v164_v63 = vadd.f32 %v157_v52, %v520_v33 }
 0x144   :  { %v159_v3 = vmul.f32 0.6931472, %v399_v27  ;;  %v249_v2 = vsub.f32 %v163_v58, %v243_v59  ;;  %v300_v0 = vadd.f32 %v294_v55, %v260_v60 }
 0x145   :  { %v299_v6 = vadd.f32 %v293_v22, %v259_v62  ;;  %v250_v7 = vsub.f32 %v164_v63, %v244_v61  ;;  %v183_v8 = vpop.xlane.xlu1 %182  ;;  %v236_v11 = vpop.xlane.xlu0 %235 }
 0x146   :  { %307 = vst.msk [vmem:[#allocation2 + $0x10] sm:$0xff] %vm80_vm6, %v300_v0  ;;  %v261_v5 = vsub.f32 %v249_v2, %v255_v4  ;;  %v165_v28 = vadd.f32 %v159_v3, %v522_v34  ;;  %v245_v9 = vmul.f32 0.003125, %v183_v8  ;;  %v256_v12 = vmul.f32 0.9, %v236_v11 }
 0x147   :  { %306 = vst.msk [vmem:[#allocation2 + $0x8] sm:$0xff] %vm80_vm6, %v299_v6 }
 0x148   :  { %v301_v33 = vadd.f32 %v295_v1, %v261_v5  ;;  %v262_v14 = vsub.f32 %v250_v7, %v256_v12  ;;  %v251_v16 = vsub.f32 %v165_v28, %v245_v9 }
 0x149   :  { %v239_v15 = vpop.xlane.xlu1 %238  ;;  %v314_v23 = vld [vmem:[#allocation2] sm:$0xff] }
 0x14a   :  { %308 = vst.msk [vmem:[#allocation2 + $0x18] sm:$0xff] %vm80_vm6, %v301_v33  ;;  %v302_v17 = vadd.f32 %v296_v13, %v262_v14  ;;  %v257_v18 = vmul.f32 0.9, %v239_v15  ;;  %v320_v25 = vsel %vm80_vm6, %v314_v23, 0.0 }
 0x14c   :  { %309 = vst.msk [vmem:[#allocation2 + $0x20] sm:$0xff] %vm80_vm6, %v302_v17  ;;  %v263_v20 = vsub.f32 %v251_v16, %v257_v18 }
 0x14d   :  { %v316_v10 = vld [vmem:[#allocation2 + $0x10] sm:$0xff] }
 0x14e   :  { %v303_v24 = vadd.f32 %v297_v19, %v263_v20  ;;  %v315_v34 = vld [vmem:[#allocation2 + $0x8] sm:$0xff]  ;;  %v323_v31 = vsel %vm80_vm6, %v316_v10, 0.0 }
 0x14f   :  { %v321_v26 = vsel %vm80_vm6, %v315_v34, 0.0 }
 0x150   :  { %310 = vst.msk [vmem:[#allocation2 + $0x28] sm:$0xff] %vm80_vm6, %v303_v24  ;;  %v322_v29 = vadd.f32 %v321_v26, %v320_v25 }
 0x151   :  { %v317_v30 = vld [vmem:[#allocation2 + $0x18] sm:$0xff] }
 0x152   :  { %v324_v32 = vadd.f32 %v323_v31, %v322_v29  ;;  %v325_v35 = vsel %vm80_vm6, %v317_v30, 0.0 }
 0x153   :  { %v318_v36 = vld [vmem:[#allocation2 + $0x20] sm:$0xff] }
 0x154   :  { %v326_v37 = vadd.f32 %v325_v35, %v324_v32  ;;  %v327_v38 = vsel %vm80_vm6, %v318_v36, 0.0 }
 0x156   :  { %v328_v40 = vadd.f32 %v327_v38, %v326_v37 }
 0x157   :  { %v319_v39 = vld [vmem:[#allocation2 + $0x28] sm:$0xff] }
 0x158   :  { %v329_v41 = vsel %vm80_vm6, %v319_v39, 0.0 }
 0x159   :  { %v330_v42 = vadd.f32 %v329_v41, %v328_v40 }
 0x15b   :  { %331 = vadd.xlane.f32.xlu0 %v330_v42 }
 0x1e4   :  { %v332_v43 = vpop.xlane.xlu0 %331 }
 0x1e5   :  { %v333_v44 = vrot.slane %v332_v43, 4 }
 0x1e7   :  { %v334_v45 = vadd.f32 %v333_v44, %v332_v43 }
 0x1e9   :  { %v335_v46 = vrot.slane %v334_v45, 2 }
 0x1eb   :  { %v336_v47 = vadd.f32 %v335_v46, %v334_v45 }
 0x1ed   :  { %v337_v48 = vrot.slane %v336_v47, 1 }
 0x1ef   :  { %v338_v21 = vadd.f32 %v337_v48, %v336_v47 }
 0x1f1   :  { %369 = vpush %v338_v21 }
 0x222   :  { %s370_s5 = spop %369 }
 0x223   :  { %v340_v49 = vstv %s370_s5 }
 0x224   :  { %342 = vst [vmem:[#allocation3] sm:$0xff] %v340_v49 }
 0x225   :  { %411 = shalt.err (!%p408_p4)
}
 0x226   :  { %352 = dma.vmem_to_hbm [thread:$0]  %s350_s4, 128, %s583_s2, [#allocation4]  }
 0x227   :  { %420 = dma.done.wait [#allocation4], 128  }
 0x228   :  { %421 = vsyncadd [#allocation4], 4294967168 }
 0x229   :  { %356 = vsyncpa [#allocation4], 1 }

</bundles_post_ra>
